<compile_context>
chip_gen: v7x
topology: tpu7x:2x2x1
jax: 0.10.0
libtpu: 0.0.40
codegen_flags: <defaults>
</compile_context>

<pallas_src>
import functools
import math

import numpy as np
import jax
import jax.numpy as jnp
from jax import lax
from jax.experimental import pallas as pl
from jax.experimental.pallas import tpu as pltpu


def _round_up(x, m):
    return ((x + m - 1) // m) * m


# ----------------------------------------------------------------------------
# DCT / sparsity helpers (parameter setup glue, plain numpy / JAX)
# ----------------------------------------------------------------------------
def dct_matrix(n):
    """Orthonormal DCT-II matrix C: dct(x) = C @ x, idct(y) = C.T @ y."""
    k = np.arange(n, dtype=np.float64)[:, None]
    m = np.arange(n, dtype=np.float64)[None, :]
    c = np.sqrt(2.0 / n) * np.cos(np.pi * (2.0 * m + 1.0) * k / (2.0 * n))
    c[0, :] *= 1.0 / np.sqrt(2.0)
    return c.astype(np.float32)


def _triu_count(out_dim, in_dim, offset):
    return np.triu_indices(out_dim, offset, in_dim)[0].size


def get_sparse_config(in_dim, out_dim, sparsity_level):
    """Same search as DctLSTM.get_sparse_config (returns (num_coeffs, num_diag))."""
    total_el = in_dim * out_dim
    thr = int(total_el * (1 - sparsity_level))
    non_zeros = total_el
    num_diag = 0
    for num_diag in range(in_dim):
        non_zeros = _triu_count(out_dim, in_dim, num_diag)
        if non_zeros < thr:
            break
    if num_diag == 0:
        for neg_diag in range(-1, -out_dim, -1):
            new_non_zeros = _triu_count(out_dim, in_dim, neg_diag)
            if new_non_zeros > thr:
                break
            else:
                non_zeros = new_non_zeros
                num_diag = neg_diag
    return non_zeros, num_diag


def get_dct_init(key, dim_out, dim_in, diag_shift, c_out, c_in):
    """Mirrors DctLSTM.get_dct_init (deterministic via JAX PRNG)."""
    initrange = 1.0 / math.sqrt(dim_out)
    init = jax.random.uniform(key, (dim_out, dim_in), jnp.float32,
                              -initrange, initrange)
    # dct_2d(init, norm='ortho') == C_out @ init @ C_in^T
    init_f = jnp.fliplr(jnp.asarray(c_out) @ init @ jnp.asarray(c_in).T)
    rows, cols = np.triu_indices(dim_out, diag_shift, dim_in)
    return init_f[rows, cols]


def scatter_flip(coeffs, dim_out, dim_in, diag_shift):
    """zero_weights.index_put_(triu_indices, coeffs) followed by fliplr."""
    rows, cols = np.triu_indices(dim_out, diag_shift, dim_in)
    s = jnp.zeros((dim_out, dim_in), jnp.float32).at[rows, cols].set(coeffs)
    return jnp.fliplr(s)


# ----------------------------------------------------------------------------
# Pallas kernel 1: dense weight generation from sparse DCT coefficients
# ----------------------------------------------------------------------------
def _dct_weight_kernel(cht_ref, s_ref, cx_ref, out_ref):
    # out = C_out^T @ S @ C_in  (2-D orthonormal IDCT of the flipped sparse matrix)
    tmp = jnp.dot(cht_ref[...], s_ref[0], preferred_element_type=jnp.float32)
    out_ref[0] = jnp.dot(tmp, cx_ref[...], preferred_element_type=jnp.float32)


def dct_weights(c_out, s_stack, c_in):
    g, h, x = s_stack.shape
    cht = jnp.asarray(np.ascontiguousarray(c_out.T))
    cx = jnp.asarray(c_in)
    # VMEM budget: single-buffered DCT matrices + double-buffered S/out blocks + tmp.
    vmem_need = 4 * (h * h + x * x) + 2 * 2 * 4 * h * x + 4 * h * x
    vmem_limit = int(min(128 * 2 ** 20, max(32 * 2 ** 20, int(vmem_need * 1.5))))
    # TODO(synk): for H,In >= ~2048 additionally tile the In axis of this one-time kernel.
    out = pl.pallas_call(
        _dct_weight_kernel,
        out_shape=jax.ShapeDtypeStruct((g, h, x), jnp.float32),
        grid_spec=pltpu.PrefetchScalarGridSpec(
            num_scalar_prefetch=0,
            grid=(g,),
            in_specs=[
                pl.BlockSpec((h, h), lambda i: (0, 0),
                             pipeline_mode=pl.Buffered(1)),
                pl.BlockSpec((1, h, x), lambda i: (i, 0, 0)),
                pl.BlockSpec((x, x), lambda i: (0, 0),
                             pipeline_mode=pl.Buffered(1)),
            ],
            out_specs=pl.BlockSpec((1, h, x), lambda i: (i, 0, 0)),
        ),
        # the 4 gates are independent -> shard across cores where available
        compiler_params=pltpu.CompilerParams(
            dimension_semantics=("parallel",),
            vmem_limit_bytes=vmem_limit),
    )(cht, s_stack, cx)
    return out.reshape(g * h, x)


# ----------------------------------------------------------------------------
# Pallas kernel 2: chunked LSTM recurrence over the sequence
# ----------------------------------------------------------------------------
def _lstm_kernel(x_ref, wih_t_ref, whh_t_ref, b_ref,
                 out_ref, c_fin_ref,
                 x2d_scr, xg_scr, h_scr, c_scr,
                 *, hidden_pad, batch_tile, chunk, seq_len, needs_mask,
                 compute_dtype, inner_unroll):
    t_chunk = pl.program_id(1)
    n_chunks = pl.num_programs(1)
    HP = hidden_pad
    BT = batch_tile

    # Reset the recurrent state at the start of every batch tile's time sweep.
    @pl.when(t_chunk == 0)
    def _():
        h_scr[...] = jnp.zeros_like(h_scr)
        c_scr[...] = jnp.zeros_like(c_scr)

    # (1) Stage the [chunk, BT, INP] input block as a dense 2-D [chunk*BT, INP] tile
    #     (static per-timestep copies; avoids an in-kernel reshape relayout), then
    #     hoist the whole chunk's non-recurrent projection (+ bias) into ONE MXU
    #     matmul with f32 accumulation (bf16 operands).
    for t in range(chunk):
        x2d_scr[pl.ds(t * BT, BT), :] = x_ref[t]
    xg_scr[...] = (
        jnp.dot(x2d_scr[...].astype(compute_dtype), wih_t_ref[...],
                preferred_element_type=jnp.float32)
        + b_ref[...])

    whh = whh_t_ref[...]   # resident recurrent weight (bf16), hoisted out of the loop

    # (2) Sequential recurrence: per step only [BT,HP]@[HP,4*HP] + gate math.
    #     Gate slot mapping follows the torch forward_step split order:
    #     slot 0 -> tanh candidate, slots 1..3 -> sigmoid (input, forget, output).
    #     Slices are 128-lane aligned because HP is a multiple of 128.
    def step(t, carry, masked):
        h, c = carry
        row0 = pl.multiple_of(t * BT, BT)
        g = xg_scr[pl.ds(row0, BT), :] + jnp.dot(
            h.astype(whh.dtype), whh, preferred_element_type=jnp.float32)
        cand = jnp.tanh(g[:, 0 * HP:1 * HP])
        i_g = jax.nn.sigmoid(g[:, 1 * HP:2 * HP])
        f_g = jax.nn.sigmoid(g[:, 2 * HP:3 * HP])
        o_g = jax.nn.sigmoid(g[:, 3 * HP:4 * HP])
        c_new = i_g * cand + f_g * c
        h_new = o_g * jnp.tanh(c_new)
        if masked:
            # only the last chunk can contain zero-padded tail timesteps
            valid = (t_chunk * chunk + t) < seq_len
            h_new = jnp.where(valid, h_new, h)
            c_new = jnp.where(valid, c_new, c)
        out_ref[t] = h_new.astype(out_ref.dtype)   # bf16 sequence output
        return (h_new, c_new)

    def run_chunk(masked):
        h, c = lax.fori_loop(
            0, chunk, functools.partial(step, masked=masked),
            (h_scr[...], c_scr[...]), unroll=inner_unroll)
        h_scr[...] = h
        c_scr[...] = c

    if needs_mask:
        # Mask only where it is needed: the last time chunk.
        @pl.when(t_chunk < n_chunks - 1)
        def _():
            run_chunk(False)

        @pl.when(t_chunk == n_chunks - 1)
        def _():
            run_chunk(True)
    else:
        run_chunk(False)

    # final cell state is only needed once -> write only on the last time chunk
    @pl.when(t_chunk == n_chunks - 1)
    def _():
        c_fin_ref[...] = c_scr[...]


# ----------------------------------------------------------------------------
# Module wrapper
# ----------------------------------------------------------------------------
class DctLSTMPallas:
    def __init__(self, input_dim, hidden_dim, sparsity_ih, sparsity_hh, key,
                 compute_dtype=jnp.bfloat16, out_dtype=jnp.bfloat16,
                 time_chunk=32, inner_unroll=2):
        self.input_dim = input_dim
        self.hidden_dim = hidden_dim
        self.compute_dtype = compute_dtype    # MXU operand dtype; gate/cell math is f32
        self.out_dtype = out_dtype            # dtype of the [T,B,H] sequence output
        self.time_chunk = time_chunk          # timesteps per grid step (TT*BT >= 256)
        self.inner_unroll = inner_unroll      # partial unroll of the recurrent loop
        # TODO(synk): weight_drop / dropout_dct (nn.Dropout) are 0 / False in this
        #             config (inference path), so dropout is omitted.
        self.c_in = dct_matrix(input_dim)
        self.c_hid = dct_matrix(hidden_dim)
        self.in_coeffs_dim, self.in_num_diags = get_sparse_config(
            input_dim, hidden_dim, sparsity_ih)
        self.hidden_coeffs_dim, self.hidden_num_diags = get_sparse_config(
            hidden_dim, hidden_dim, sparsity_hh)

        keys = jax.random.split(key, 9)
        # order: iig, ifg, ihg, iog / hig, hfg, hhg, hog (same as the torch lists)
        self.in_coeffs = [
            get_dct_init(keys[i], hidden_dim, input_dim, self.in_num_diags,
                         self.c_hid, self.c_in) for i in range(4)]
        self.hid_coeffs = [
            get_dct_init(keys[4 + i], hidden_dim, hidden_dim,
                         self.hidden_num_diags, self.c_hid, self.c_hid)
            for i in range(4)]
        initrange = 1.0 / math.sqrt(hidden_dim)
        self.bias = jax.random.uniform(keys[8], (4 * hidden_dim,), jnp.float32,
                                       -initrange, initrange)
        self._kernel_params = None   # cached (inference: coefficients are static)

    # ---- reference-layout weights (mirrors torch get_weights) ----
    def get_weights(self):
        s_ih = jnp.stack([scatter_flip(c, self.hidden_dim, self.input_dim,
                                       self.in_num_diags)
                          for c in self.in_coeffs])          # [4, H, In]
        s_hh = jnp.stack([scatter_flip(c, self.hidden_dim, self.hidden_dim,
                                       self.hidden_num_diags)
                          for c in self.hid_coeffs])         # [4, H, H]
        w_ih = dct_weights(self.c_hid, s_ih, self.c_in)      # [4H, In]
        w_hh = dct_weights(self.c_hid, s_hh, self.c_hid)     # [4H, H]
        return jnp.concatenate([w_ih, w_hh], axis=1)         # [4H, In+H]

    # ---- kernel-layout weights: padded, transposed, gate-blocked, cached ----
    def _prepare_kernel_params(self):
        if self._kernel_params is not None:
            return self._kernel_params
        H, In = self.hidden_dim, self.input_dim
        HP = _round_up(H, 128)       # lane-aligned hidden dim
        INP = _round_up(In, 128)     # lane-aligned input dim

        s_ih = jnp.stack([scatter_flip(c, H, In, self.in_num_diags)
                          for c in self.in_coeffs])
        s_hh = jnp.stack([scatter_flip(c, H, H, self.hidden_num_diags)
                          for c in self.hid_coeffs])
        w_ih_g = dct_weights(self.c_hid, s_ih, self.c_in).reshape(4, H, In)
        w_hh_g = dct_weights(self.c_hid, s_hh, self.c_hid).reshape(4, H, H)

        # Transposed, gate-padded layouts: gate g occupies lanes [g*HP, g*HP+H);
        # padded rows/cols/bias are zero so padded hidden lanes provably stay zero.
        wih_t = jnp.zeros((INP, 4 * HP), jnp.float32)
        whh_t = jnp.zeros((HP, 4 * HP), jnp.float32)
        bias2d = jnp.zeros((1, 4 * HP), jnp.float32)
        b_g = self.bias.reshape(4, H)
        for g in range(4):
            wih_t = wih_t.at[:In, g * HP:g * HP + H].set(w_ih_g[g].T)
            whh_t = whh_t.at[:H, g * HP:g * HP + H].set(w_hh_g[g].T)
            bias2d = bias2d.at[0, g * HP:g * HP + H].set(b_g[g])

        wih_t = wih_t.astype(self.compute_dtype)
        whh_t = whh_t.astype(self.compute_dtype)
        self._kernel_params = (wih_t, whh_t, bias2d, HP, INP)
        return self._kernel_params

    def forward(self, x_seq, time_chunk=None, batch_tile=None):
        # TODO(synk): an externally supplied initial `hidden` state is not supported;
        #             state is zero-initialized (matches torch forward(hidden=None)).
        T, B, In = x_seq.shape
        H = self.hidden_dim
        wih_t, whh_t, bias2d, HP, INP = self._prepare_kernel_params()

        TT = max(1, int(min(self.time_chunk if time_chunk is None else time_chunk, T)))
        T_pad = _round_up(T, TT)
        needs_mask = (T_pad != T)
        n_tc = T_pad // TT

        # Batch tiling: single sublane-aligned tile by default; multiple tiles add a
        # leading 'parallel' grid axis (v7x: 2 TensorCores can shard it).  For best
        # throughput fold independent sequences into the batch dim (fills MXU rows).
        if batch_tile is None or batch_tile >= B:
            BT = _round_up(B, 8)
            BP = BT
        else:
            BT = _round_up(batch_tile, 16)   # 16 keeps bf16 output blocks tileable
            BP = _round_up(B, BT)
        n_bt = BP // BT

        # Pad only when needed (each pad/unpad is a full extra HBM pass).  x is fed in
        # its native dtype and cast to bf16 inside the kernel (no host cast pass).
        if (B == BP) and (In == INP) and (T == T_pad):
            x_in = x_seq
        else:
            x_in = jnp.zeros((T_pad, BP, INP), x_seq.dtype).at[:T, :B, :In].set(x_seq)

        # Partial unroll of the recurrent loop (bounds vreg pressure at large H).
        if TT % self.inner_unroll == 0:
            unroll = self.inner_unroll
        elif TT <= 8:
            unroll = True
        else:
            unroll = 1

        # Explicit VMEM budget (real buffer sum + 50% headroom).
        x_bytes = jnp.dtype(x_in.dtype).itemsize
        w_bytes = jnp.dtype(self.compute_dtype).itemsize
        o_bytes = jnp.dtype(self.out_dtype).itemsize
        vmem_need = (
            2 * TT * BT * INP * x_bytes        # x block (double-buffered)
            + INP * 4 * HP * w_bytes           # Wih_t (resident, Buffered(1))
            + HP * 4 * HP * w_bytes            # Whh_t (resident, Buffered(1))
            + 4 * HP * 4                       # bias  (resident, Buffered(1))
            + 2 * TT * BT * HP * o_bytes       # out block (double-buffered, bf16)
            + 2 * BT * HP * 4                  # c_fin block
            + TT * BT * INP * x_bytes          # staged 2-D x chunk
            + TT * BT * 4 * HP * 4             # chunk gate pre-activations
            + 2 * BT * HP * 4)                 # h/c carries
        vmem_limit = int(min(128 * 2 ** 20, max(32 * 2 ** 20, int(vmem_need * 1.5))))

        kernel = functools.partial(
            _lstm_kernel, hidden_pad=HP, batch_tile=BT, chunk=TT, seq_len=T,
            needs_mask=needs_mask, compute_dtype=self.compute_dtype,
            inner_unroll=unroll)

        outs_pad, c_fin_pad = pl.pallas_call(
            kernel,
            out_shape=(jax.ShapeDtypeStruct((T_pad, BP, HP), self.out_dtype),
                       jax.ShapeDtypeStruct((BP, HP), jnp.float32)),
            grid_spec=pltpu.PrefetchScalarGridSpec(
                num_scalar_prefetch=0,
                grid=(n_bt, n_tc),
                in_specs=[
                    # per (batch-tile, time-chunk) activations
                    pl.BlockSpec((TT, BT, INP), lambda b, t: (t, b, 0)),
                    # resident weights / bias: constant block index + single buffer.
                    # TODO(synk): at very large H on v7x, stream Wih_t instead.
                    pl.BlockSpec((INP, 4 * HP), lambda b, t: (0, 0),
                                 pipeline_mode=pl.Buffered(1)),
                    pl.BlockSpec((HP, 4 * HP), lambda b, t: (0, 0),
                                 pipeline_mode=pl.Buffered(1)),
                    pl.BlockSpec((1, 4 * HP), lambda b, t: (0, 0),
                                 pipeline_mode=pl.Buffered(1)),
                ],
                out_specs=[
                    pl.BlockSpec((TT, BT, HP), lambda b, t: (t, b, 0)),
                    pl.BlockSpec((BT, HP), lambda b, t: (b, 0)),
                ],
                scratch_shapes=[
                    pltpu.VMEM((TT * BT, INP), x_in.dtype),      # staged x chunk
                    pltpu.VMEM((TT * BT, 4 * HP), jnp.float32),  # chunk gate pre-acts
                    pltpu.VMEM((BT, HP), jnp.float32),           # h carry
                    pltpu.VMEM((BT, HP), jnp.float32),           # c carry
                ],
            ),
            compiler_params=pltpu.CompilerParams(
                dimension_semantics=("parallel", "arbitrary"),
                vmem_limit_bytes=vmem_limit),
        )(x_in, wih_t, whh_t, bias2d)

        outs = outs_pad
        if not (T == T_pad and B == BP and H == HP):
            outs = outs_pad[:T, :B, :H]
        c_fin = c_fin_pad if (B == BP and H == HP) else c_fin_pad[:B, :H]
        op = jnp.squeeze(outs)        # mirrors torch.squeeze(torch.stack(outputs))
        hidden = (outs[-1], c_fin)    # (out_T, c_T); out_T is in out_dtype (bf16)
        return op, hidden


# Pure-JAX reference of the torch forward_step loop (for verification only).
# `compute_dtype` applies to the matmul operands, matching the kernel's MXU dtype.
def reference_forward(x_seq, weights, bias, hidden_dim,
                      compute_dtype=jnp.float32):
    T, B, _ = x_seq.shape
    H = hidden_dim
    w = weights.astype(compute_dtype)
    h = jnp.zeros((B, H), jnp.float32)
    c = jnp.zeros((B, H), jnp.float32)
    outs = []
    for t in range(T):
        xh = jnp.concatenate([x_seq[t], h], axis=1).astype(compute_dtype)
        g = jnp.dot(xh, w.T, preferred_element_type=jnp.float32) + bias
        hh = jnp.tanh(g[:, :H])
        ii = jax.nn.sigmoid(g[:, H:2 * H])
        ff = jax.nn.sigmoid(g[:, 2 * H:3 * H])
        oo = jax.nn.sigmoid(g[:, 3 * H:4 * H])
        c = ii * hh + ff * c
        h = oo * jnp.tanh(c)
        outs.append(h)
    return jnp.squeeze(jnp.stack(outs)), (h, c)


if __name__ == "__main__":
    input_dim, hidden_dim = 16, 32
    seq_len = 8
    sparsity_ih, sparsity_hh = 0.5, 0.5

    key = jax.random.PRNGKey(0)
    k_mod, k_x1, k_x2 = jax.random.split(key, 3)

    model = DctLSTMPallas(input_dim, hidden_dim, sparsity_ih, sparsity_hh, k_mod,
                          compute_dtype=jnp.bfloat16)
    w = model.get_weights()   # reference-layout combined weight [4H, In+H]

    def _np32(x):
        return np.asarray(jnp.asarray(x, jnp.float32))

    def check(op, h, c, op_ref, h_ref, c_ref):
        np.testing.assert_allclose(_np32(op), _np32(op_ref), rtol=2e-2, atol=2e-2)
        np.testing.assert_allclose(_np32(h), _np32(h_ref), rtol=2e-2, atol=2e-2)
        np.testing.assert_allclose(_np32(c), _np32(c_ref), rtol=2e-2, atol=2e-2)

    # Case 1: small batch (B=2), time_chunk=4 -> 2 chunks; carries cross grid steps.
    x1 = jax.random.normal(k_x1, (seq_len, 2, input_dim), jnp.float32)
    op1, (h1, c1) = model.forward(x1, time_chunk=4)
    op1 = jax.block_until_ready(op1)
    ref_op1, (ref_h1, ref_c1) = reference_forward(
        x1, w, model.bias, hidden_dim, compute_dtype=model.compute_dtype)
    check(op1, h1, c1, ref_op1, ref_h1, ref_c1)

    # Case 2: time_chunk=3 does not divide T=8 -> exercises the masked last chunk.
    op2, (h2, c2) = model.forward(x1, time_chunk=3)
    op2 = jax.block_until_ready(op2)
    check(op2, h2, c2, ref_op1, ref_h1, ref_c1)

    # Case 3: larger batch split into two tiles -> exercises the 'parallel' batch axis.
    x3 = jax.random.normal(k_x2, (seq_len, 32, input_dim), jnp.float32)
    op3, (h3, c3) = model.forward(x3, time_chunk=4, batch_tile=16)
    op3 = jax.block_until_ready(op3)
    ref_op3, (ref_h3, ref_c3) = reference_forward(
        x3, w, model.bias, hidden_dim, compute_dtype=model.compute_dtype)
    check(op3, h3, c3, ref_op3, ref_h3, ref_c3)

    print("KERNEL_OK")
</pallas_src>

<mosaic_0001>
module attributes {stable_mosaic.version = 11 : i64} {
  func.func @_dct_weight_kernel(%arg0: i32, %arg1: memref<32x32xf32, #tpu.memory_space<vmem>>, %arg2: memref<1x32x16xf32, #tpu.memory_space<vmem>>, %arg3: memref<16x16xf32, #tpu.memory_space<vmem>>, %arg4: memref<1x32x16xf32, #tpu.memory_space<vmem>>) attributes {dimension_semantics = [#tpu.dimension_semantics<parallel>], iteration_bounds = array<i64: 4>, scalar_prefetch = 0 : i64, scratch_operands = 0 : i64, tpu.core_type = #tpu.core_type<tc>, window_params = [{pipeline_mode = #tpu.pipeline_mode<synchronous>, transform_indices = @transform_0, window_bounds = array<i64: 32, 32>}, {transform_indices = @transform_1, window_bounds = array<i64: 1, 32, 16>}, {pipeline_mode = #tpu.pipeline_mode<synchronous>, transform_indices = @transform_2, window_bounds = array<i64: 16, 16>}, {transform_indices = @transform_3, window_bounds = array<i64: 1, 32, 16>}]} {
    %c0 = arith.constant 0 : index
    %c0_0 = arith.constant 0 : index
    %0 = vector.load %arg1[%c0, %c0_0] : memref<32x32xf32, #tpu.memory_space<vmem>>, vector<32x32xf32>
    %c0_1 = arith.constant 0 : index
    %c0_2 = arith.constant 0 : index
    %c0_3 = arith.constant 0 : index
    %1 = vector.load %arg2[%c0_1, %c0_2, %c0_3] : memref<1x32x16xf32, #tpu.memory_space<vmem>>, vector<1x32x16xf32>
    %2 = vector.shape_cast %1 : vector<1x32x16xf32> to vector<32x16xf32>
    %cst = arith.constant dense<0.000000e+00> : vector<32x16xf32>
    %3 = tpu.matmul %0, %2, %cst {dimension_numbers = #tpu.dot_dimension_numbers<[1], [0], [0], [1], [0, 0, 1, 1], [], []>} : vector<32x32xf32>, vector<32x16xf32>, vector<32x16xf32> -> vector<32x16xf32>
    %c0_4 = arith.constant 0 : index
    %c0_5 = arith.constant 0 : index
    %4 = vector.load %arg3[%c0_4, %c0_5] : memref<16x16xf32, #tpu.memory_space<vmem>>, vector<16x16xf32>
    %cst_6 = arith.constant dense<0.000000e+00> : vector<32x16xf32>
    %5 = tpu.matmul %3, %4, %cst_6 {dimension_numbers = #tpu.dot_dimension_numbers<[1], [0], [0], [1], [0, 0, 1, 1], [], []>} : vector<32x16xf32>, vector<16x16xf32>, vector<32x16xf32> -> vector<32x16xf32>
    %c0_7 = arith.constant 0 : index
    %c0_8 = arith.constant 0 : index
    %c0_9 = arith.constant 0 : index
    %6 = vector.load %arg4[%c0_7, %c0_8, %c0_9] : memref<1x32x16xf32, #tpu.memory_space<vmem>>, vector<1x32x16xf32>
    %7 = vector.shape_cast %6 : vector<1x32x16xf32> to vector<32x16xf32>
    %8 = vector.shape_cast %5 : vector<32x16xf32> to vector<1x32x16xf32>
    tpu.vector_store %arg4[%c0_7, %c0_8, %c0_9], %8 {strides = array<i32>} : memref<1x32x16xf32, #tpu.memory_space<vmem>>, vector<1x32x16xf32>,
    return
  }
  func.func @transform_0(%arg0: i32) -> (i32, i32) {
    %c0_i32 = arith.constant 0 : i32
    %c0_i32_0 = arith.constant 0 : i32
    %c0_i32_1 = arith.constant 0 : i32
    return %c0_i32, %c0_i32_0 : i32, i32
  }
  func.func @transform_1(%arg0: i32) -> (i32, i32, i32) {
    %c0_i32 = arith.constant 0 : i32
    %c0_i32_0 = arith.constant 0 : i32
    %c0_i32_1 = arith.constant 0 : i32
    return %arg0, %c0_i32, %c0_i32_0 : i32, i32, i32
  }
  func.func @transform_2(%arg0: i32) -> (i32, i32) {
    %c0_i32 = arith.constant 0 : i32
    %c0_i32_0 = arith.constant 0 : i32
    %c0_i32_1 = arith.constant 0 : i32
    return %c0_i32, %c0_i32_0 : i32, i32
  }
  func.func @transform_3(%arg0: i32) -> (i32, i32, i32) {
    %c0_i32 = arith.constant 0 : i32
    %c0_i32_0 = arith.constant 0 : i32
    %c0_i32_1 = arith.constant 0 : i32
    return %arg0, %c0_i32, %c0_i32_0 : i32, i32, i32
  }
}

</mosaic_0001>

<bundles_post_ra>
// kernel: tpu_custom_call.1
= control target key start
LH: loop header
LB: loop body
LE: loop exit
PB: predicated region body
PF: predicated region fallthrough
CT: control target
= control target key end

     0   :  { %s543_s12 = smov 0   ;;  %s597_s0 = inlined_call_operand.vmem [shape: f32[32,32], index: 0, kind: input, shape index: {}]   ;;  %s598_s1 = inlined_call_operand.vmem [shape: f32[4,32,16], index: 1, kind: input, shape index: {}]   ;;  %s599_s2 = inlined_call_operand.vmem [shape: f32[16,16], index: 2, kind: input, shape index: {}]   ;;  %s600_s3 = inlined_call_operand.vmem [shape: f32[4,32,16], index: 3, kind: output, shape index: {}]  }
   0x1 LB: > { %s436_s13 = sadd.s32 4294967295, %s521_s12   ;;  %p440_p0 = scmp.ge.s32.totalorder %s521_s12, 1  ;;  %s521_s12 = sphi %s543_s12, %s13_s12  }
   0x2   : > { %p137_p1 = scmp.lt.s32.totalorder %s521_s12, 5 }
   0x4   : > { %p138_p2 = pnand %p440_p0, %p137_p1 }
   0x5   : > { %p161_p3 = scmp.lt.s32.totalorder (!%p138_p2), %s436_s13, 3  ;;  %v171_v0 = vld [vmem:[%s597_s0] sm:$0xff] (!%p138_p2)  ;;  %vm179_vm0 = vcmask (!%p138_p2), 261120   ;;  %v278_v2 = vld [vmem:[%s599_s2 + $0x8] sm:$0xff] (!%p138_p2)  ;;  %v173_v11 = vld [vmem:[%s597_s0 + $0x10] sm:$0xff] (!%p138_p2)  ;;  %vm279_vm1 = vcmask (!%p138_p2), 130048  }
   0x6   : > { %141 = sbr.rel (%p138_p2) target bundleno = 459 (0x1cb), region = 32  ;;  %479 = vmatprep.mubr.msk.f32.mxu0 (!%p138_p2), %vm179_vm0, %v171_v0  ;;  %v277_v1 = vld [vmem:[%s599_s2] sm:$0xff] (!%p138_p2)  ;;  %v172_v10 = vld [vmem:[%s597_s0 + $0x8] sm:$0xff] (!%p138_p2)  ;;  %v174_v12 = vld [vmem:[%s597_s0 + $0x18] sm:$0xff] (!%p138_p2) }
   0x7   : > { %v503_v3 = vpack.c.bf16 (!%p138_p2), %v278_v2, %v277_v1 }
   0x9   : > { %504 = vmatprep.subr.bf16.mxu1 (!%p138_p2), %v503_v3 }
   0xa   : > { %506 = vmatpush3.bf16.msra.mxu1 (!%p138_p2), %v503_v3 }
   0xd   : > { %s602_s13 = smov (!%p161_p3, %s436_s13), 3 }
   0xe   : > { %s455_s20 = sshll.u32 %s602_s13, 5 }
   0xf   : > { %s165_s23 = scalar_lea.vmem %s598_s1, %s455_s20  ;;  %s170_s5 = scalar_lea.vmem %s600_s3, %s455_s20 }
  0x10   : > { %v175_v4 = vld [vmem:[%s165_s23] sm:$0xff]  ;;  %v176_v5 = vld [vmem:[%s165_s23 + $0x8] sm:$0xff]  ;;  %v177_v6 = vld [vmem:[%s165_s23 + $0x10] sm:$0xff] }
  0x11   : > { %v495_v7 = vpack.c.bf16 %v176_v5, %v175_v4  ;;  %v178_v8 = vld [vmem:[%s165_s23 + $0x18] sm:$0xff] }
  0x12   : > { %v499_v9 = vpack.c.bf16 %v178_v8, %v177_v6 }
  0x13   : > { %496 = vmatprep.subr.bf16.mxu0 %v495_v7 }
  0x14   : > { %498 = vmatpush3.bf16.msra.mxu0 %v495_v7 }
  0x15   : > { %500 = vmatprep.subr.bf16.mxu0 %v499_v9 }
  0x18   : > { %502 = vmatpush3.bf16.msra.mxu0 %v499_v9 }
  0x1b   : > { %480 = vmatmul.mubr.msk.f32.vlgmr.msra.gmra.mrb[0].mxu0 %vm179_vm0, %v172_v10 }
  0x1c   : > { %482 = vmatprep.mubr.msk.f32.mxu0 %vm179_vm0, %v173_v11 }
  0x1f   : > { %483 = vmatmul.mubr.msk.f32.gmra.mrb[2].mxu0 %vm179_vm0, %v174_v12 }
  0xee   : > { %v481_v13 = vpop.f32.mrb[0].mxu0 }
  0xef   : > { %v258_v14 = vpop.f32.mrb[1].mxu0 }
  0xf0   : > { %489 = vmatprep.mubr.msk.f32.mxu1 %vm279_vm1, %v258_v14 }
  0xf1   : > { %490 = vmatmul.mubr.msk.f32.vlgmr.msra.gmra.mrb[0].mxu1 %vm279_vm1, %v481_v13 }
  0xf2   : > { %v484_v15 = vpop.f32.mrb[2].mxu0 }
  0xf3   : > { %v268_v16 = vpop.f32.mrb[3].mxu0 }
  0xf4   : > { %492 = vmatprep.mubr.msk.f32.mxu1 %vm279_vm1, %v268_v16 }
  0xf5   : > { %493 = vmatmul.mubr.msk.f32.gmra.mrb[2].mxu1 %vm279_vm1, %v484_v15 }
 0x1c4   : > { %v491_v17 = vpop.f32.mrb[0].mxu1 }
 0x1c5   : > { %378 = vst.msk [vmem:[%s170_s5 + $0x8] sm:$0xff] %vm279_vm1, %v491_v17  ;;  %v358_v18 = vpop.f32.mrb[1].mxu1 }
 0x1c6   : > { %377 = vst.msk [vmem:[%s170_s5] sm:$0xff] %vm279_vm1, %v358_v18 }
 0x1c8   : > { %v494_v19 = vpop.f32.mrb[2].mxu1 }
 0x1c9   : > { %380 = vst.msk [vmem:[%s170_s5 + $0x18] sm:$0xff] %vm279_vm1, %v494_v19  ;;  %v368_v20 = vpop.f32.mrb[3].mxu1 }
 0x1ca   : > { %379 = vst.msk [vmem:[%s170_s5 + $0x10] sm:$0xff] %vm279_vm1, %v368_v20 }
 0x1cb PF: > { %s13_s12 = sadd.s32 1, %s521_s12  }
 0x1cc   : > { %p10_p4 = scmp.ge.s32.totalorder %s13_s12, 6  }
 0x1ce   :  { %12 = sbr.rel (!%p10_p4) target bundleno = 1 (0x1), region = 62 }

</bundles_post_ra>
